<compile_context>
chip_gen: v6e
topology: v6e:2x2x1
jax: 0.10.0
libtpu: 0.0.40
codegen_flags: <defaults>
</compile_context>

<pallas_src>
import jax
import jax.numpy as jnp
from jax import lax
from jax.experimental import pallas as pl
from jax.experimental.pallas import tpu as pltpu


_SUB_ROWS = 128  # rows per in-kernel sub-tile (bounds tail vreg live ranges)


def _memory_net_kernel(x_ref, w1_ref, b1_ref, w2k_ref, b2k_ref, mv_ref,
                       selt_ref, o_ref):
    tm, D = x_ref.shape
    DC = mv_ref.shape[1]
    C = DC // D
    n_sub = tm // _SUB_ROWS  # static Python int

    def body(t, carry):
        r0 = pl.multiple_of(t * _SUB_ROWS, _SUB_ROWS)
        x = x_ref[pl.ds(r0, _SUB_ROWS), :]            # (TS, D) f32
        x_bf = x.astype(jnp.bfloat16)

        # query_projection Linear #1 + ReLU (bf16 MXU, f32 accumulation).
        h = jnp.dot(x_bf, w1_ref[...],
                    preferred_element_type=jnp.float32) + b1_ref[...]
        h = jnp.maximum(h, 0.0)

        # Linear #2 folded with the scaled memory key:
        #   logits = (h @ w2 + b2) @ (mk / sqrt(D)).T  ==  h @ w2k + b2k
        logits = jnp.dot(h.astype(jnp.bfloat16), w2k_ref[...],
                         preferred_element_type=jnp.float32) + b2k_ref[...]

        # Softmax over memory slots (f32 on the VPU, reciprocal on the EUP).
        logits = logits - jnp.max(logits, axis=-1, keepdims=True)
        p = jnp.exp(logits)
        p = p * pl.reciprocal(jnp.sum(p, axis=-1, keepdims=True), approx=True)

        # Residual weights: (TS, S) @ (S, D*C) -> (TS, D*C).
        rw = jnp.dot(p.astype(jnp.bfloat16), mv_ref[...],
                     preferred_element_type=jnp.float32)

        # x.repeat(1, 1, C): pure lane replication (no MXU, no rep matrix).
        x_rep = jnp.tile(x, (1, C))                   # (TS, D*C) f32
        prod = x_rep * rw                             # f32 elementwise

        # reshape(.., D, C).sum(-2), emitted transposed so the HBM store is
        # lane-dense:  out_t[c, m] = sum_j sel_t[c, j] * prod[m, j].
        out_t = lax.dot_general(
            selt_ref[...], prod,
            dimension_numbers=(((1,), (1,)), ((), ())),
            preferred_element_type=jnp.float32,
        )                                             # (C, TS)
        o_ref[:, pl.ds(r0, _SUB_ROWS)] = out_t.astype(o_ref.dtype)
        return carry

    lax.fori_loop(0, n_sub, body, 0, unroll=True)


def memory_network_forward(x, params, *, tm=None):
    """x: (B, T, d_model) float32.  Returns (B, T, c_out)."""
    w1, b1, w2, b2, mk, mv = (params[k] for k in
                              ("w1", "b1", "w2", "b2", "memory_key",
                               "memory_value"))
    B, T, D = x.shape
    S = mk.shape[0]
    DC = mv.shape[1]
    C = DC // D
    M = B * T

    if tm is None:
        # Big tiles amortize the ~0.35 us per-grid-step overhead; keep at
        # least 2 grid steps when M allows it so both v7x TensorCores get
        # work via dimension_semantics=("parallel",).
        tm = 512
        while tm > _SUB_ROWS and pl.cdiv(M, tm) < 2:
            tm //= 2
    tm = max(_SUB_ROWS, (tm // _SUB_ROWS) * _SUB_ROWS)

    # Pad the row count up to a multiple of tm (padded rows are zeros; their
    # results are sliced off below).
    M_pad = pl.cdiv(M, tm) * tm
    xf = x.reshape(M, D)
    if M_pad != M:
        xf = jnp.pad(xf, ((0, M_pad - M), (0, 0)))
    # TODO(synk): on v5e (0.82 TB/s HBM) the x stream dominates traffic; a
    # bf16 x input would halve it but loosens the f32 elementwise tail.

    # --- weight prep (constant-folds / fuses under jit) --------------------
    inv_sqrt_d = 1.0 / (D ** 0.5)
    mk_scaled = (mk * inv_sqrt_d).astype(jnp.float32)            # (S, D) f32
    # Fold Linear #2 into the scaled memory key IN F32, then cast once.
    w2k = (w2 @ mk_scaled.T).astype(jnp.bfloat16)                # (D, S)
    b2k = (b2 @ mk_scaled.T).reshape(1, S).astype(jnp.float32)   # (1, S)
    w1b = w1.astype(jnp.bfloat16)
    b1r = b1.reshape(1, D).astype(jnp.float32)
    mvb = mv.astype(jnp.bfloat16)

    # Constant 0/1 selection matrix for the reshape(.., D, C).sum(-2) tail,
    # emitted transposed: sel_t[c, j] = 1 iff j % C == c.  Built once here.
    j_idx = jnp.arange(DC)
    sel_t = (j_idx[None, :] % C == jnp.arange(C)[:, None]).astype(jnp.float32)

    # VMEM budget from actual buffer sizes (double-buffered x / out blocks +
    # resident weights + compute headroom), clamped to a v7x-safe range.
    weight_bytes = (D * D * 2 + D * 4 + D * S * 2 + S * 4
                    + S * DC * 2 + C * DC * 4)
    pipeline_bytes = 2 * (tm * D * 4 + C * tm * 4) + 2 * weight_bytes
    headroom = 8 * _SUB_ROWS * DC * 4
    vmem_limit = int(min(max(2 * (pipeline_bytes + headroom),
                             32 * 1024 * 1024),
                         48 * 1024 * 1024))

    # NOTE: if D / S / D*C grow, the constant-index weight BlockSpecs can take
    # pipeline_mode=pl.Buffered(1) to drop their redundant second pipeline
    # buffer (matters first on v7x's 64 MiB VMEM); negligible at these sizes.
    out_t = pl.pallas_call(
        _memory_net_kernel,
        out_shape=jax.ShapeDtypeStruct((C, M_pad), x.dtype),
        grid_spec=pltpu.PrefetchScalarGridSpec(
            num_scalar_prefetch=0,
            grid=(M_pad // tm,),
            in_specs=[
                pl.BlockSpec((tm, D), lambda i: (i, 0)),   # x rows (pipelined)
                pl.BlockSpec((D, D), lambda i: (0, 0)),    # w1 (bf16)
                pl.BlockSpec((1, D), lambda i: (0, 0)),    # b1 (f32)
                pl.BlockSpec((D, S), lambda i: (0, 0)),    # w2 @ mk_scaled.T (bf16)
                pl.BlockSpec((1, S), lambda i: (0, 0)),    # b2 @ mk_scaled.T (f32)
                pl.BlockSpec((S, DC), lambda i: (0, 0)),   # memory_value (bf16)
                pl.BlockSpec((C, DC), lambda i: (0, 0)),   # selection matrix^T
            ],
            # Transposed (C, tm) output block: last dim is a multiple of 128
            # -> unmasked, lane-dense HBM stores.
            out_specs=pl.BlockSpec((C, tm), lambda i: (0, i)),
        ),
        compiler_params=pltpu.CompilerParams(
            dimension_semantics=("parallel",),
            vmem_limit_bytes=vmem_limit,
        ),
    )(xf, w1b, b1r, w2k, b2k, mvb, sel_t)

    # (C, M_pad) -> (M, C) -> (B, T, C)
    return out_t[:, :M].T.reshape(B, T, C)


def _reference_forward(x, params):
    """Pure-JAX f32 replica of the PyTorch forward (for verification)."""
    w1, b1, w2, b2, mk, mv = (params[k] for k in
                              ("w1", "b1", "w2", "b2", "memory_key",
                               "memory_value"))
    B, T, D = x.shape
    C = mv.shape[1] // D
    q = jnp.maximum(x @ w1 + b1, 0.0) @ w2 + b2
    attn = jax.nn.softmax((q @ mk.T) / (D ** 0.5), axis=-1)
    rw = attn @ mv
    x_rep = jnp.tile(x, (1, 1, C)).reshape(B, T, D * C)
    out = (x_rep * rw).reshape(B, T, D, C).sum(axis=-2)
    return out


def init_params(key, memory_size, d_model, c_out):
    ks = jax.random.split(key, 6)
    scale = 0.02
    return {
        "memory_key": scale * jax.random.normal(
            ks[0], (memory_size, d_model), jnp.float32),
        "memory_value": scale * jax.random.normal(
            ks[1], (memory_size, d_model * c_out), jnp.float32),
        # Linear layers stored as (in, out) so y = x @ W + b
        "w1": jax.random.normal(ks[2], (d_model, d_model), jnp.float32)
              * (1.0 / d_model ** 0.5),
        "b1": jnp.zeros((d_model,), jnp.float32),
        "w2": jax.random.normal(ks[3], (d_model, d_model), jnp.float32)
              * (1.0 / d_model ** 0.5),
        "b2": jnp.zeros((d_model,), jnp.float32),
    }


if __name__ == "__main__":
    B, T = 2, 8            # batch, pred_len
    d_model = 32
    memory_size = 16
    c_out = 4

    key = jax.random.PRNGKey(0)
    pkey, xkey = jax.random.split(key)
    params = init_params(pkey, memory_size, d_model, c_out)
    x = jax.random.normal(xkey, (B, T, d_model), jnp.float32)

    fwd = jax.jit(memory_network_forward)
    out = jax.block_until_ready(fwd(x, params))

    ref = _reference_forward(x, params)
    assert out.shape == (B, T, c_out)
    # bf16 MXU operands + approx reciprocal: tolerance relaxed vs the f32 ref.
    assert jnp.allclose(out, ref, atol=2e-3, rtol=2e-2), "mismatch vs reference"

    print("KERNEL_OK")
</pallas_src>

<mosaic_0001>
module attributes {stable_mosaic.version = 11 : i64} {
  func.func @_memory_net_kernel(%arg0: i32, %arg1: memref<128x32xf32, #tpu.memory_space<vmem>>, %arg2: memref<32x32xbf16, #tpu.memory_space<vmem>>, %arg3: memref<1x32xf32, #tpu.memory_space<vmem>>, %arg4: memref<32x16xbf16, #tpu.memory_space<vmem>>, %arg5: memref<1x16xf32, #tpu.memory_space<vmem>>, %arg6: memref<16x128xbf16, #tpu.memory_space<vmem>>, %arg7: memref<4x128xf32, #tpu.memory_space<vmem>>, %arg8: memref<4x128xf32, #tpu.memory_space<vmem>>) attributes {dimension_semantics = [#tpu.dimension_semantics<parallel>], iteration_bounds = array<i64: 1>, scalar_prefetch = 0 : i64, scratch_operands = 0 : i64, tpu.core_type = #tpu.core_type<tc>, window_params = [{transform_indices = @transform_0, window_bounds = array<i64: 128, 32>}, {pipeline_mode = #tpu.pipeline_mode<synchronous>, transform_indices = @transform_1, window_bounds = array<i64: 32, 32>}, {pipeline_mode = #tpu.pipeline_mode<synchronous>, transform_indices = @transform_2, window_bounds = array<i64: 1, 32>}, {pipeline_mode = #tpu.pipeline_mode<synchronous>, transform_indices = @transform_3, window_bounds = array<i64: 32, 16>}, {pipeline_mode = #tpu.pipeline_mode<synchronous>, transform_indices = @transform_4, window_bounds = array<i64: 1, 16>}, {pipeline_mode = #tpu.pipeline_mode<synchronous>, transform_indices = @transform_5, window_bounds = array<i64: 16, 128>}, {pipeline_mode = #tpu.pipeline_mode<synchronous>, transform_indices = @transform_6, window_bounds = array<i64: 4, 128>}, {transform_indices = @transform_7, window_bounds = array<i64: 4, 128>}]} {
    %c0_i32 = arith.constant 0 : i32
    %c128_i32 = arith.constant 128 : i32
    %0 = arith.muli %c0_i32, %c128_i32 : i32
    %1 = tpu.assume_multiple %0, 128 : i32
    %2 = arith.index_cast %1 : i32 to index
    %c0 = arith.constant 0 : index
    %3 = vector.load %arg1[%2, %c0] : memref<128x32xf32, #tpu.memory_space<vmem>>, vector<128x32xf32>
    %4 = arith.truncf %3 : vector<128x32xf32> to vector<128x32xbf16>
    %c0_0 = arith.constant 0 : index
    %c0_1 = arith.constant 0 : index
    %5 = vector.load %arg2[%c0_0, %c0_1] : memref<32x32xbf16, #tpu.memory_space<vmem>>, vector<32x32xbf16>
    %cst = arith.constant dense<0.000000e+00> : vector<128x32xf32>
    %6 = tpu.matmul %4, %5, %cst {dimension_numbers = #tpu.dot_dimension_numbers<[1], [0], [0], [1], [0, 0, 1, 1], [], []>} : vector<128x32xbf16>, vector<32x32xbf16>, vector<128x32xf32> -> vector<128x32xf32>
    %c0_2 = arith.constant 0 : index
    %c0_3 = arith.constant 0 : index
    %7 = vector.load %arg3[%c0_2, %c0_3] : memref<1x32xf32, #tpu.memory_space<vmem>>, vector<1x32xf32>
    %8 = vector.broadcast %7 : vector<1x32xf32> to vector<128x32xf32>
    %9 = arith.addf %6, %8 : vector<128x32xf32>
    %cst_4 = arith.constant 0.000000e+00 : f32
    %10 = vector.broadcast %cst_4 : f32 to vector<128x32xf32>
    %11 = arith.maximumf %9, %10 : vector<128x32xf32>
    %12 = arith.truncf %11 : vector<128x32xf32> to vector<128x32xbf16>
    %c0_5 = arith.constant 0 : index
    %c0_6 = arith.constant 0 : index
    %13 = vector.load %arg4[%c0_5, %c0_6] : memref<32x16xbf16, #tpu.memory_space<vmem>>, vector<32x16xbf16>
    %cst_7 = arith.constant dense<0.000000e+00> : vector<128x16xf32>
    %14 = tpu.matmul %12, %13, %cst_7 {dimension_numbers = #tpu.dot_dimension_numbers<[1], [0], [0], [1], [0, 0, 1, 1], [], []>} : vector<128x32xbf16>, vector<32x16xbf16>, vector<128x16xf32> -> vector<128x16xf32>
    %c0_8 = arith.constant 0 : index
    %c0_9 = arith.constant 0 : index
    %15 = vector.load %arg5[%c0_8, %c0_9] : memref<1x16xf32, #tpu.memory_space<vmem>>, vector<1x16xf32>
    %16 = vector.broadcast %15 : vector<1x16xf32> to vector<128x16xf32>
    %17 = arith.addf %14, %16 : vector<128x16xf32>
    %cst_10 = arith.constant dense<0xFF800000> : vector<128xf32>
    %18 = vector.multi_reduction <maximumf>, %17, %cst_10 [1] : vector<128x16xf32> to vector<128xf32>
    %19 = vector.shape_cast %18 : vector<128xf32> to vector<128x1xf32>
    %20 = vector.broadcast %19 : vector<128x1xf32> to vector<128x16xf32>
    %21 = arith.subf %17, %20 : vector<128x16xf32>
    %22 = math.exp %21 : vector<128x16xf32>
    %cst_11 = arith.constant dense<0.000000e+00> : vector<128xf32>
    %23 = vector.multi_reduction <add>, %22, %cst_11 [1] : vector<128x16xf32> to vector<128xf32>
    %24 = vector.shape_cast %23 : vector<128xf32> to vector<128x1xf32>
    %25 = tpu.reciprocal %24 {approx = true} : vector<128x1xf32> -> vector<128x1xf32>
    %26 = vector.broadcast %25 : vector<128x1xf32> to vector<128x16xf32>
    %27 = arith.mulf %22, %26 : vector<128x16xf32>
    %28 = arith.truncf %27 : vector<128x16xf32> to vector<128x16xbf16>
    %c0_12 = arith.constant 0 : index
    %c0_13 = arith.constant 0 : index
    %29 = vector.load %arg6[%c0_12, %c0_13] : memref<16x128xbf16, #tpu.memory_space<vmem>>, vector<16x128xbf16>
    %cst_14 = arith.constant dense<0.000000e+00> : vector<128x128xf32>
    %30 = tpu.matmul %28, %29, %cst_14 {dimension_numbers = #tpu.dot_dimension_numbers<[1], [0], [0], [1], [0, 0, 1, 1], [], []>} : vector<128x16xbf16>, vector<16x128xbf16>, vector<128x128xf32> -> vector<128x128xf32>
    %31 = tpu.concatenate %3, %3, %3, %3 in 1 : vector<128x32xf32>, vector<128x32xf32>, vector<128x32xf32>, vector<128x32xf32> -> vector<128x128xf32>
    %32 = arith.mulf %31, %30 : vector<128x128xf32>
    %c0_15 = arith.constant 0 : index
    %c0_16 = arith.constant 0 : index
    %33 = vector.load %arg7[%c0_15, %c0_16] : memref<4x128xf32, #tpu.memory_space<vmem>>, vector<4x128xf32>
    %cst_17 = arith.constant dense<0.000000e+00> : vector<4x128xf32>
    %34 = tpu.matmul %33, %32, %cst_17 {dimension_numbers = #tpu.dot_dimension_numbers<[1], [1], [0], [0], [0, 0, 1, 0], [], []>} : vector<4x128xf32>, vector<128x128xf32>, vector<4x128xf32> -> vector<4x128xf32>
    %c0_18 = arith.constant 0 : index
    %35 = arith.index_cast %1 : i32 to index
    %36 = vector.load %arg8[%c0_18, %35] : memref<4x128xf32, #tpu.memory_space<vmem>>, vector<4x128xf32>
    tpu.vector_store %arg8[%c0_18, %35], %34 {strides = array<i32>} : memref<4x128xf32, #tpu.memory_space<vmem>>, vector<4x128xf32>,
    %c1_i32 = arith.constant 1 : i32
    return
  }
  func.func @transform_0(%arg0: i32) -> (i32, i32) {
    %c0_i32 = arith.constant 0 : i32
    %c0_i32_0 = arith.constant 0 : i32
    return %arg0, %c0_i32 : i32, i32
  }
  func.func @transform_1(%arg0: i32) -> (i32, i32) {
    %c0_i32 = arith.constant 0 : i32
    %c0_i32_0 = arith.constant 0 : i32
    %c0_i32_1 = arith.constant 0 : i32
    return %c0_i32, %c0_i32_0 : i32, i32
  }
  func.func @transform_2(%arg0: i32) -> (i32, i32) {
    %c0_i32 = arith.constant 0 : i32
    %c0_i32_0 = arith.constant 0 : i32
    %c0_i32_1 = arith.constant 0 : i32
    return %c0_i32, %c0_i32_0 : i32, i32
  }
  func.func @transform_3(%arg0: i32) -> (i32, i32) {
    %c0_i32 = arith.constant 0 : i32
    %c0_i32_0 = arith.constant 0 : i32
    %c0_i32_1 = arith.constant 0 : i32
    return %c0_i32, %c0_i32_0 : i32, i32
  }
  func.func @transform_4(%arg0: i32) -> (i32, i32) {
    %c0_i32 = arith.constant 0 : i32
    %c0_i32_0 = arith.constant 0 : i32
    %c0_i32_1 = arith.constant 0 : i32
    return %c0_i32, %c0_i32_0 : i32, i32
  }
  func.func @transform_5(%arg0: i32) -> (i32, i32) {
    %c0_i32 = arith.constant 0 : i32
    %c0_i32_0 = arith.constant 0 : i32
    %c0_i32_1 = arith.constant 0 : i32
    return %c0_i32, %c0_i32_0 : i32, i32
  }
  func.func @transform_6(%arg0: i32) -> (i32, i32) {
    %c0_i32 = arith.constant 0 : i32
    %c0_i32_0 = arith.constant 0 : i32
    %c0_i32_1 = arith.constant 0 : i32
    return %c0_i32, %c0_i32_0 : i32, i32
  }
  func.func @transform_7(%arg0: i32) -> (i32, i32) {
    %c0_i32 = arith.constant 0 : i32
    %c0_i32_0 = arith.constant 0 : i32
    return %c0_i32, %arg0 : i32, i32
  }
}

</mosaic_0001>

<bundles_post_ra>
// kernel: memory_network_forward.1
= control target key start
LH: loop header
LB: loop body
LE: loop exit
PB: predicated region body
PF: predicated region fallthrough
CT: control target
= control target key end

     0   :  { %vm74_vm0 = vcmask 261120   ;;  %vm364_vm1 = vcmask 130048   ;;  %s1232_s19 = smov 32   ;;  %s1233_s20 = smov 96   ;;  %vm1235_vm2 = vmmov 0   ;;  %vm854_vm3 = vcmask 523264   ;;  %s1849_s1 = inlined_call_operand.vmem [shape: bf16[32,32], index: 1, kind: input, shape index: {}]   ;;  %s1850_s0 = inlined_call_operand.vmem [shape: f32[128,32], index: 0, kind: input, shape index: {}]   ;;  %s1851_s3 = inlined_call_operand.vmem [shape: bf16[32,16], index: 3, kind: input, shape index: {}]   ;;  %s1852_s2 = inlined_call_operand.vmem [shape: f32[1,32], index: 2, kind: input, shape index: {}]   ;;  %s1853_s4 = inlined_call_operand.vmem [shape: f32[1,16], index: 4, kind: input, shape index: {}]   ;;  %s1854_s5 = inlined_call_operand.vmem [shape: bf16[16,128], index: 5, kind: input, shape index: {}]   ;;  %s1855_s6 = inlined_call_operand.vmem [shape: f32[4,128], index: 6, kind: input, shape index: {}]   ;;  %s1856_s7 = inlined_call_operand.vmem [shape: f32[4,128], index: 7, kind: output, shape index: {}]  }
   0x1   :  { %v1155_v0 = vld [vmem:[%s1849_s1 + $0x8] sm:$0xff]   ;;  %v1156_v1 = vld [vmem:[%s1849_s1] sm:$0xff]   ;;  %v1297_v5 = vld [vmem:[%s1850_s0 + $0x10] sm:$0xff]  ;;  %vm871_vm4 = vcmask 785408  }
   0x2   :  { %1057 = vmatprep.subr.bf16.mxu0 %v1155_v0  ;;  %v1285_v2 = vld [vmem:[%s1850_s0] sm:$0xff]  ;;  %v1290_v3 = vld [vmem:[%s1850_s0 + $0x8] sm:$0xff]  ;;  %v1302_v6 = vld [vmem:[%s1850_s0 + $0x18] sm:$0xff] }
   0x3   :  { %1058 = vmatpush3.bf16.msra.mxu0 %v1155_v0  ;;  %v43_v4 = vpack.c.bf16 %v1290_v3, %v1285_v2  ;;  %v1307_v7 = vld [vmem:[%s1850_s0 + $0x20] sm:$0xff]  ;;  %v1312_v8 = vld [vmem:[%s1850_s0 + $0x28] sm:$0xff]  ;;  %v44_v9 = vpack.c.bf16 %v1302_v6, %v1297_v5  ;;  %v1324_v11 = vld [vmem:[%s1850_s0 + $0x30] sm:$0xff] }
   0x4   :  { %1059 = vmatprep.subr.bf16.mxu0 %v1156_v1  ;;  %v45_v10 = vpack.c.bf16 %v1312_v8, %v1307_v7  ;;  %v1329_v12 = vld [vmem:[%s1850_s0 + $0x38] sm:$0xff]  ;;  %v1334_v13 = vld [vmem:[%s1850_s0 + $0x40] sm:$0xff]  ;;  %v1339_v14 = vld [vmem:[%s1850_s0 + $0x48] sm:$0xff] }
   0x5   :  { %1061 = vmatprep.mubr.msk.bf16.mxu0 %vm74_vm0, %v43_v4  ;;  %v46_v15 = vpack.c.bf16 %v1329_v12, %v1324_v11  ;;  %v47_v16 = vpack.c.bf16 %v1339_v14, %v1334_v13  ;;  %v1350_v17 = vld [vmem:[%s1850_s0 + $0x50] sm:$0xff]  ;;  %v1355_v18 = vld [vmem:[%s1850_s0 + $0x58] sm:$0xff]  ;;  %v1360_v19 = vld [vmem:[%s1850_s0 + $0x60] sm:$0xff] }
   0x6   :  { %v1365_v20 = vld [vmem:[%s1850_s0 + $0x68] sm:$0xff]  ;;  %v48_v21 = vpack.c.bf16 %v1355_v18, %v1350_v17  ;;  %v1376_v23 = vld [vmem:[%s1850_s0 + $0x70] sm:$0xff]  ;;  %v1381_v24 = vld [vmem:[%s1850_s0 + $0x78] sm:$0xff] }
   0x7   :  { %1060 = vmatpush3.bf16.msra.mxu0 %v1156_v1  ;;  %v49_v22 = vpack.c.bf16 %v1365_v20, %v1360_v19  ;;  %v50_v25 = vpack.c.bf16 %v1381_v24, %v1376_v23  ;;  %v1157_v26 = vld [vmem:[%s1851_s3 + $0x8] sm:$0xff]   ;;  %v1158_v27 = vld [vmem:[%s1851_s3] sm:$0xff]  }
   0x8   :  { %1077 = vmatprep.subr.bf16.mxu1 %v1157_v26  ;;  %v980_v30 = vld [vmem:[%s1852_s2] ss:$0 sm:$0xff] }
   0x9   :  { %1078 = vmatpush3.bf16.msra.mxu1 %v1157_v26 }
   0xa   :  { %1062 = vmatmul.mubr.msk.bf16.vlgmr.msra.gmra.mxu0 %vm74_vm0, %v44_v9  ;;  %1079 = vmatprep.subr.bf16.mxu1 %v1158_v27 }
   0xb   :  { %1065 = vmatprep.mubr.msk.bf16.mxu0 %vm74_vm0, %v45_v10 }
   0xd   :  { %1080 = vmatpush3.bf16.msra.mxu1 %v1158_v27 }
  0x12   :  { %1066 = vmatmul.mubr.msk.bf16.gmra.mxu0 %vm74_vm0, %v46_v15 }
  0x13   :  { %1069 = vmatprep.mubr.msk.bf16.mxu0 %vm74_vm0, %v47_v16 }
  0x1a   :  { %1070 = vmatmul.mubr.msk.bf16.gmra.mxu0 %vm74_vm0, %v48_v21 }
  0x1b   :  { %1073 = vmatprep.mubr.msk.bf16.mxu0 %vm74_vm0, %v49_v22 }
  0x22   :  { %1074 = vmatmul.mubr.msk.bf16.gmra.mxu0 %vm74_vm0, %v50_v25 }
  0xca   :  { %v1063_v28 = vpop.f32.mrf.mxu0 }
  0xcb   :  { %v142_v34 = vadd.f32 %v1063_v28, %v980_v30 }
  0xcc   :  { %v133_v29 = vpop.f32.mrf.mxu0 }
  0xcd   :  { %v134_v32 = vadd.f32 %v980_v30, %v133_v29  ;;  %v198_v41 = vmax.f32 %v142_v34, 0.0 }
  0xce   :  { %v1064_v31 = vpop.f32.mrf.mxu0 }
  0xcf   :  { %v145_v33 = vadd.f32 %v1064_v31, %v980_v30  ;;  %v196_v39 = vmax.f32 %v134_v32, 0.0 }
  0xd0   :  { %v136_v35 = vpop.f32.mrf.mxu0 }
  0xd1   :  { %v137_v36 = vadd.f32 %v980_v30, %v136_v35  ;;  %v199_v37 = vmax.f32 %v145_v33, 0.0 }
  0xd2   :  { %v1067_v38 = vpop.f32.mrf.mxu0 }
  0xd3   :  { %v197_v40 = vmax.f32 %v137_v36, 0.0  ;;  %v213_v44 = vpack.c.bf16 %v199_v37, %v198_v41  ;;  %v158_v48 = vadd.f32 %v1067_v38, %v980_v30  ;;  %v991_v38 = vld [vmem:[%s1853_s4] ss:$0 sm:$0xff] }
  0xd4   :  { %v149_v42 = vpop.f32.mrf.mxu0 }
  0xd5   :  { %v212_v43 = vpack.c.bf16 %v197_v40, %v196_v39  ;;  %v150_v46 = vadd.f32 %v980_v30, %v149_v42  ;;  %v202_v55 = vmax.f32 %v158_v48, 0.0 }
  0xd6   :  { %v1068_v45 = vpop.f32.mrf.mxu0 }
  0xd7   :  { %v161_v47 = vadd.f32 %v1068_v45, %v980_v30  ;;  %1081 = vmatprep.mubr.msk.bf16.mxu1 %vm74_vm0, %v212_v43  ;;  %v200_v53 = vmax.f32 %v150_v46, 0.0 }
  0xd8   :  { %v152_v49 = vpop.f32.mrf.mxu0  ;;  %1082 = vmatmul.mubr.msk.bf16.vlgmr.msra.gmra.mxu1 %vm74_vm0, %v213_v44 }
  0xd9   :  { %v153_v50 = vadd.f32 %v980_v30, %v152_v49  ;;  %v203_v51 = vmax.f32 %v161_v47, 0.0 }
  0xda   :  { %v1071_v52 = vpop.f32.mrf.mxu0 }
  0xdb   :  { %v201_v54 = vmax.f32 %v153_v50, 0.0  ;;  %v215_v58 = vpack.c.bf16 %v203_v51, %v202_v55  ;;  %v174_v62 = vadd.f32 %v1071_v52, %v980_v30 }
  0xdc   :  { %v165_v56 = vpop.f32.mrf.mxu0 }
  0xdd   :  { %v214_v57 = vpack.c.bf16 %v201_v54, %v200_v53  ;;  %v166_v60 = vadd.f32 %v980_v30, %v165_v56  ;;  %v206_v15 = vmax.f32 %v174_v62, 0.0 }
  0xde   :  { %v1072_v59 = vpop.f32.mrf.mxu0 }
  0xdf   :  { %v177_v61 = vadd.f32 %v1072_v59, %v980_v30  ;;  %1085 = vmatprep.mubr.msk.bf16.mxu1 %vm74_vm0, %v214_v57  ;;  %v204_v9 = vmax.f32 %v166_v60, 0.0 }
  0xe0   :  { %v168_v63 = vpop.f32.mrf.mxu0  ;;  %1086 = vmatmul.mubr.msk.bf16.gmra.mxu1 %vm74_vm0, %v215_v58 }
  0xe1   :  { %v169_v0 = vadd.f32 %v980_v30, %v168_v63  ;;  %v207_v1 = vmax.f32 %v177_v61, 0.0 }
  0xe2   :  { %v1075_v4 = vpop.f32.mrf.mxu0 }
  0xe3   :  { %v205_v10 = vmax.f32 %v169_v0, 0.0  ;;  %v217_v22 = vpack.c.bf16 %v207_v1, %v206_v15  ;;  %v190_v28 = vadd.f32 %v1075_v4, %v980_v30 }
  0xe4   :  { %v181_v16 = vpop.f32.mrf.mxu0 }
  0xe5   :  { %v216_v21 = vpack.c.bf16 %v205_v10, %v204_v9  ;;  %v182_v26 = vadd.f32 %v980_v30, %v181_v16  ;;  %v210_v35 = vmax.f32 %v190_v28, 0.0 }
  0xe6   :  { %v1076_v25 = vpop.f32.mrf.mxu0 }
  0xe7   :  { %v193_v27 = vadd.f32 %v1076_v25, %v980_v30  ;;  %1089 = vmatprep.mubr.msk.bf16.mxu1 %vm74_vm0, %v216_v21  ;;  %v208_v33 = vmax.f32 %v182_v26, 0.0 }
  0xe8   :  { %v184_v29 = vpop.f32.mrf.mxu0  ;;  %1090 = vmatmul.mubr.msk.bf16.gmra.mxu1 %vm74_vm0, %v217_v22 }
  0xe9   :  { %v185_v31 = vadd.f32 %v980_v30, %v184_v29  ;;  %v211_v32 = vmax.f32 %v193_v27, 0.0 }
  0xeb   :  { %v209_v34 = vmax.f32 %v185_v31, 0.0  ;;  %v219_v37 = vpack.c.bf16 %v211_v32, %v210_v35 }
  0xed   :  { %v218_v36 = vpack.c.bf16 %v209_v34, %v208_v33 }
  0xef   :  { %1093 = vmatprep.mubr.msk.bf16.mxu1 %vm74_vm0, %v218_v36 }
  0xf0   :  { %1094 = vmatmul.mubr.msk.bf16.gmra.mxu1 %vm74_vm0, %v219_v37 }
 0x198   :  { %v1083_v39 = vpop.f32.mrf.mxu1 }
 0x199   :  { %v1406_v40 = vadd.f32 %v1083_v39, %v991_v38 }
 0x19a   :  { %v301_v41 = vpop.f32.mrf.mxu1 }
 0x19b   :  { %v1408_v30 = vadd.f32 %v991_v38, %v301_v41  ;;  %v371_v42 = vsel %vm364_vm1, %v1406_v40, -inf  ;;  %v1159_v41 = vld [vmem:[%s1854_s5] sm:$0xff]   ;;  %s1231_s5 = smov 64  }
 0x19c   :  { %372 = vmax.xlane.f32.xlu1 %v371_v42  ;;  %v1084_v43 = vpop.f32.mrf.mxu1  ;;  %1097 = vmatprep.subr.bf16.mxu0 %v1159_v41 }
 0x19d   :  { %v1412_v44 = vadd.f32 %v1084_v43, %v991_v38  ;;  %v365_v45 = vsel %vm364_vm1, %v1408_v30, -inf  ;;  %1098 = vmatpush3.bf16.msra.mxu0 %v1159_v41 }
 0x19e   :  { %v304_v46 = vpop.f32.mrf.mxu1  ;;  %366 = vmax.xlane.f32.xlu0 %v365_v45 }
 0x19f   :  { %v1416_v47 = vadd.f32 %v991_v38, %v304_v46  ;;  %v374_v48 = vsel %vm364_vm1, %v1412_v44, -inf }
 0x1a0   :  { %375 = vmax.xlane.f32.xlu1 %v374_v48  ;;  %v1087_v49 = vpop.f32.mrf.mxu1 }
 0x1a1   :  { %v368_v50 = vsel %vm364_vm1, %v1416_v47, -inf  ;;  %v1424_v54 = vadd.f32 %v1087_v49, %v991_v38 }
 0x1a2   :  { %v317_v51 = vpop.f32.mrf.mxu1  ;;  %369 = vmax.xlane.f32.xlu0 %v368_v50 }
 0x1a3   :  { %v1422_v52 = vadd.f32 %v991_v38, %v317_v51  ;;  %v383_v61 = vsel %vm364_vm1, %v1424_v54, -inf }
 0x1a4   :  { %v1088_v53 = vpop.f32.mrf.mxu1 }
 0x1a5   :  { %v377_v55 = vsel %vm364_vm1, %v1422_v52, -inf  ;;  %v1430_v59 = vadd.f32 %v1088_v53, %v991_v38 }
 0x1a6   :  { %v320_v56 = vpop.f32.mrf.mxu1  ;;  %378 = vmax.xlane.f32.xlu0 %v377_v55 }
 0x1a7   :  { %v1428_v57 = vadd.f32 %v991_v38, %v320_v56  ;;  %v386_v4 = vsel %vm364_vm1, %v1430_v59, -inf }
 0x1a8   :  { %v1091_v58 = vpop.f32.mrf.mxu1 }
 0x1a9   :  { %v380_v60 = vsel %vm364_vm1, %v1428_v57, -inf  ;;  %v1438_v1 = vadd.f32 %v1091_v58, %v991_v38 }
 0x1aa   :  { %v333_v62 = vpop.f32.mrf.mxu1  ;;  %381 = vmax.xlane.f32.xlu1 %v380_v60  ;;  %384 = vmax.xlane.f32.xlu0 %v383_v61 }
 0x1ab   :  { %v1436_v63 = vadd.f32 %v991_v38, %v333_v62  ;;  %v395_v25 = vsel %vm364_vm1, %v1438_v1, -inf }
 0x1ac   :  { %v1092_v0 = vpop.f32.mrf.mxu1 }
 0x1ad   :  { %v389_v9 = vsel %vm364_vm1, %v1436_v63, -inf  ;;  %v1446_v21 = vadd.f32 %v1092_v0, %v991_v38 }
 0x1ae   :  { %v336_v10 = vpop.f32.mrf.mxu1  ;;  %387 = vmax.xlane.f32.xlu1 %v386_v4  ;;  %390 = vmax.xlane.f32.xlu0 %v389_v9 }
 0x1af   :  { %v1444_v15 = vadd.f32 %v991_v38, %v336_v10  ;;  %v398_v31 = vsel %vm364_vm1, %v1446_v21, -inf }
 0x1b0   :  { %v1095_v16 = vpop.f32.mrf.mxu1 }
 0x1b1   :  { %v392_v22 = vsel %vm364_vm1, %v1444_v15, -inf  ;;  %v1454_v29 = vadd.f32 %v1095_v16, %v991_v38 }
 0x1b2   :  { %v349_v26 = vpop.f32.mrf.mxu1  ;;  %393 = vmax.xlane.f32.xlu1 %v392_v22  ;;  %396 = vmax.xlane.f32.xlu0 %v395_v25 }
 0x1b3   :  { %v1452_v27 = vadd.f32 %v991_v38, %v349_v26  ;;  %v407_v37 = vsel %vm364_vm1, %v1454_v29, -inf }
 0x1b4   :  { %v1096_v28 = vpop.f32.mrf.mxu1 }
 0x1b5   :  { %v401_v32 = vsel %vm364_vm1, %v1452_v27, -inf  ;;  %v1462_v35 = vadd.f32 %v1096_v28, %v991_v38 }
 0x1b6   :  { %v352_v33 = vpop.f32.mrf.mxu1  ;;  %399 = vmax.xlane.f32.xlu1 %v398_v31  ;;  %402 = vmax.xlane.f32.xlu0 %v401_v32 }
 0x1b7   :  { %v1460_v34 = vadd.f32 %v991_v38, %v352_v33  ;;  %v410_v39 = vsel %vm364_vm1, %v1462_v35, -inf }
 0x1b9   :  { %v404_v36 = vsel %vm364_vm1, %v1460_v34, -inf }
 0x1ba   :  { %405 = vmax.xlane.f32.xlu1 %v404_v36  ;;  %408 = vmax.xlane.f32.xlu0 %v407_v37 }
 0x1be   :  { %411 = vmax.xlane.f32.xlu1 %v410_v39 }
 0x225   :  { %v373_v38 = vpop.xlane.xlu1 %372 }
 0x226   :  { %v415_v42 = vsub.f32 %v1406_v40, %v373_v38 }
 0x227   :  { %v367_v43 = vpop.xlane.xlu0 %366 }
 0x228   :  { %v413_v45 = vsub.f32 %v1408_v30, %v367_v43  ;;  %v433_v48 = vmul.f32 1.442695, %v415_v42 }
 0x229   :  { %v376_v46 = vpop.xlane.xlu1 %375 }
 0x22a   :  { %v429_v49 = vmul.f32 1.442695, %v413_v45  ;;  %v416_v50 = vsub.f32 %v1412_v44, %v376_v46 }
 0x22b   :  { %v370_v51 = vpop.xlane.xlu0 %369 }
 0x22c   :  { %1160 = vpow2.f32 %v429_v49  ;;  %v414_v53 = vsub.f32 %v1416_v47, %v370_v51  ;;  %v435_v55 = vmul.f32 1.442695, %v416_v50 }
 0x22d   :  { %1162 = vpow2.f32 %v433_v48 }
 0x22e   :  { %v431_v56 = vmul.f32 1.442695, %v414_v53 }
 0x22f   :  { %v379_v58 = vpop.xlane.xlu0 %378 }
 0x230   :  { %1164 = vpow2.f32 %v431_v56  ;;  %v417_v60 = vsub.f32 %v1422_v52, %v379_v58 }
 0x231   :  { %1166 = vpow2.f32 %v435_v55 }
 0x232   :  { %v437_v40 = vmul.f32 1.442695, %v417_v60 }
 0x233   :  { %v382_v61 = vpop.xlane.xlu1 %381  ;;  %v385_v30 = vpop.xlane.xlu0 %384 }
 0x234   :  { %1168 = vpow2.f32 %v437_v40  ;;  %v418_v62 = vsub.f32 %v1428_v57, %v382_v61  ;;  %v419_v44 = vsub.f32 %v1424_v54, %v385_v30 }
 0x236   :  { %v439_v0 = vmul.f32 1.442695, %v418_v62  ;;  %v441_v4 = vmul.f32 1.442695, %v419_v44 }
 0x237   :  { %v388_v9 = vpop.xlane.xlu1 %387  ;;  %v391_v47 = vpop.xlane.xlu0 %390 }
 0x238   :  { %1170 = vpow2.f32 %v439_v0  ;;  %v420_v10 = vsub.f32 %v1430_v59, %v388_v9  ;;  %v421_v16 = vsub.f32 %v1436_v63, %v391_v47 }
 0x239   :  { %v1482_v22 = vpop.eup %1160  ;;  %1172 = vpow2.f32 %v441_v4 }
 0x23a   :  { %v443_v52 = vmul.f32 1.442695, %v420_v10  ;;  %v445_v25 = vmul.f32 1.442695, %v421_v16  ;;  %v461_v26 = vsel %vm364_vm1, %v1482_v22, 0.0  ;;  %v1486_v57 = vpop.eup %1162 }
 0x23b   :  { %v394_v54 = vpop.xlane.xlu1 %393  ;;  %462 = vadd.xlane.f32.xlu0 %v461_v26  ;;  %v397_v28 = vpop.xlane.xlu0 %396  ;;  %v467_v36 = vsel %vm364_vm1, %v1486_v57, 0.0 }
 0x23c   :  { %1174 = vpow2.f32 %v443_v52  ;;  %v422_v31 = vsub.f32 %v1444_v15, %v394_v54  ;;  %v423_v59 = vsub.f32 %v1438_v1, %v397_v28 }
 0x23d   :  { %v1490_v32 = vpop.eup %1164  ;;  %1176 = vpow2.f32 %v445_v25 }
 0x23e   :  { %v447_v63 = vmul.f32 1.442695, %v422_v31  ;;  %v449_v33 = vmul.f32 1.442695, %v423_v59  ;;  %v464_v37 = vsel %vm364_vm1, %v1490_v32, 0.0  ;;  %v1496_v39 = vpop.eup %1166 }
 0x23f   :  { %v400_v41 = vpop.xlane.xlu1 %399  ;;  %468 = vadd.xlane.f32.xlu0 %v467_v36  ;;  %465 = vadd.xlane.f32.xlu1 %v464_v37  ;;  %v403_v38 = vpop.xlane.xlu0 %402  ;;  %v470_v46 = vsel %vm364_vm1, %v1496_v39, 0.0 }
 0x240   :  { %1178 = vpow2.f32 %v447_v63  ;;  %v424_v1 = vsub.f32 %v1446_v21, %v400_v41  ;;  %v425_v15 = vsub.f32 %v1452_v27, %v403_v38 }
 0x241   :  { %v1500_v42 = vpop.eup %1168  ;;  %1180 = vpow2.f32 %v449_v33 }
 0x242   :  { %v451_v43 = vmul.f32 1.442695, %v424_v1  ;;  %v453_v45 = vmul.f32 1.442695, %v425_v15  ;;  %v473_v48 = vsel %vm364_vm1, %v1500_v42, 0.0 }
 0x243   :  { %v406_v49 = vpop.xlane.xlu1 %405  ;;  %471 = vadd.xlane.f32.xlu1 %v470_v46  ;;  %474 = vadd.xlane.f32.xlu0 %v473_v48  ;;  %v409_v50 = vpop.xlane.xlu0 %408 }
 0x244   :  { %1182 = vpow2.f32 %v451_v43  ;;  %v426_v21 = vsub.f32 %v1460_v34, %v406_v49  ;;  %v427_v27 = vsub.f32 %v1454_v29, %v409_v50 }
 0x245   :  { %v1508_v51 = vpop.eup %1170  ;;  %1184 = vpow2.f32 %v453_v45 }
 0x246   :  { %v1510_v53 = vpop.eup %1172  ;;  %v455_v55 = vmul.f32 1.442695, %v426_v21  ;;  %v457_v56 = vmul.f32 1.442695, %v427_v27  ;;  %v476_v58 = vsel %vm364_vm1, %v1508_v51, 0.0 }
 0x247   :  { %v412_v60 = vpop.xlane.xlu1 %411  ;;  %477 = vadd.xlane.f32.xlu1 %v476_v58  ;;  %v479_v40 = vsel %vm364_vm1, %v1510_v53, 0.0 }
 0x248   :  { %1186 = vpow2.f32 %v455_v55  ;;  %v428_v34 = vsub.f32 %v1462_v35, %v412_v60  ;;  %480 = vadd.xlane.f32.xlu0 %v479_v40 }
 0x249   :  { %v1517_v29 = vpop.eup %1174  ;;  %1188 = vpow2.f32 %v457_v56 }
 0x24a   :  { %v1519_v61 = vpop.eup %1176  ;;  %v459_v30 = vmul.f32 1.442695, %v428_v34  ;;  %v482_v62 = vsel %vm364_vm1, %v1517_v29, 0.0 }
 0x24b   :  { %483 = vadd.xlane.f32.xlu1 %v482_v62  ;;  %v485_v44 = vsel %vm364_vm1, %v1519_v61, 0.0 }
 0x24c   :  { %1190 = vpow2.f32 %v459_v30  ;;  %486 = vadd.xlane.f32.xlu0 %v485_v44 }
 0x24d   :  { %v1525_v0 = vpop.eup %1178 }
 0x24e   :  { %v1527_v4 = vpop.eup %1180  ;;  %v488_v35 = vsel %vm364_vm1, %v1525_v0, 0.0 }
 0x24f   :  { %489 = vadd.xlane.f32.xlu1 %v488_v35  ;;  %v491_v9 = vsel %vm364_vm1, %v1527_v4, 0.0 }
 0x250   :  { %492 = vadd.xlane.f32.xlu0 %v491_v9 }
 0x251   :  { %v1533_v47 = vpop.eup %1182 }
 0x252   :  { %v1535_v10 = vpop.eup %1184  ;;  %v494_v16 = vsel %vm364_vm1, %v1533_v47, 0.0 }
 0x253   :  { %495 = vadd.xlane.f32.xlu1 %v494_v16  ;;  %v497_v52 = vsel %vm364_vm1, %v1535_v10, 0.0 }
 0x254   :  { %498 = vadd.xlane.f32.xlu0 %v497_v52 }
 0x255   :  { %v1541_v25 = vpop.eup %1186 }
 0x256   :  { %v1543_v26 = vpop.eup %1188  ;;  %v500_v54 = vsel %vm364_vm1, %v1541_v25, 0.0 }
 0x257   :  { %501 = vadd.xlane.f32.xlu1 %v500_v54  ;;  %v503_v28 = vsel %vm364_vm1, %v1543_v26, 0.0 }
 0x258   :  { %504 = vadd.xlane.f32.xlu0 %v503_v28 }
 0x259   :  { %v1549_v31 = vpop.eup %1190 }
 0x25a   :  { %v506_v59 = vsel %vm364_vm1, %v1549_v31, 0.0 }
 0x25b   :  { %507 = vadd.xlane.f32.xlu1 %v506_v59 }
 0x26c   :  { %772 = vrot.lane.b32.xlu1 %v1381_v24, %s1231_s5 }
 0x26e   :  { %724 = vrot.lane.b32.xlu0 %v1381_v24, %s1232_s19 }
 0x270   :  { %820 = vrot.lane.b32.xlu1 %v1381_v24, %s1233_s20 }
 0x272   :  { %770 = vrot.lane.b32.xlu0 %v1376_v23, %s1231_s5 }
 0x274   :  { %722 = vrot.lane.b32.xlu1 %v1376_v23, %s1232_s19 }
 0x276   :  { %720 = vrot.lane.b32.xlu0 %v1365_v20, %s1232_s19 }
 0x278   :  { %818 = vrot.lane.b32.xlu1 %v1376_v23, %s1233_s20 }
 0x27a   :  { %816 = vrot.lane.b32.xlu0 %v1365_v20, %s1233_s20 }
 0x27c   :  { %768 = vrot.lane.b32.xlu1 %v1365_v20, %s1231_s5 }
 0x27e   :  { %766 = vrot.lane.b32.xlu0 %v1360_v19, %s1231_s5 }
 0x280   :  { %718 = vrot.lane.b32.xlu1 %v1360_v19, %s1232_s19 }
 0x282   :  { %716 = vrot.lane.b32.xlu0 %v1355_v18, %s1232_s19 }
 0x284   :  { %814 = vrot.lane.b32.xlu1 %v1360_v19, %s1233_s20 }
 0x286   :  { %812 = vrot.lane.b32.xlu0 %v1355_v18, %s1233_s20 }
 0x288   :  { %764 = vrot.lane.b32.xlu1 %v1355_v18, %s1231_s5 }
 0x28a   :  { %762 = vrot.lane.b32.xlu0 %v1350_v17, %s1231_s5 }
 0x28c   :  { %714 = vrot.lane.b32.xlu1 %v1350_v17, %s1232_s19 }
 0x28e   :  { %712 = vrot.lane.b32.xlu0 %v1339_v14, %s1232_s19 }
 0x290   :  { %810 = vrot.lane.b32.xlu1 %v1350_v17, %s1233_s20 }
 0x292   :  { %808 = vrot.lane.b32.xlu0 %v1339_v14, %s1233_s20 }
 0x294   :  { %760 = vrot.lane.b32.xlu1 %v1339_v14, %s1231_s5 }
 0x296   :  { %758 = vrot.lane.b32.xlu0 %v1334_v13, %s1231_s5 }
 0x298   :  { %710 = vrot.lane.b32.xlu1 %v1334_v13, %s1232_s19 }
 0x29a   :  { %708 = vrot.lane.b32.xlu0 %v1329_v12, %s1232_s19 }
 0x29c   :  { %806 = vrot.lane.b32.xlu1 %v1334_v13, %s1233_s20 }
 0x29e   :  { %804 = vrot.lane.b32.xlu0 %v1329_v12, %s1233_s20 }
 0x2a0   :  { %756 = vrot.lane.b32.xlu1 %v1329_v12, %s1231_s5 }
 0x2a2   :  { %754 = vrot.lane.b32.xlu0 %v1324_v11, %s1231_s5 }
 0x2a4   :  { %706 = vrot.lane.b32.xlu1 %v1324_v11, %s1232_s19 }
 0x2a6   :  { %704 = vrot.lane.b32.xlu0 %v1312_v8, %s1232_s19 }
 0x2a8   :  { %802 = vrot.lane.b32.xlu1 %v1324_v11, %s1233_s20 }
 0x2aa   :  { %800 = vrot.lane.b32.xlu0 %v1312_v8, %s1233_s20 }
 0x2ac   :  { %752 = vrot.lane.b32.xlu1 %v1312_v8, %s1231_s5 }
 0x2ae   :  { %750 = vrot.lane.b32.xlu0 %v1307_v7, %s1231_s5 }
 0x2b0   :  { %702 = vrot.lane.b32.xlu1 %v1307_v7, %s1232_s19 }
 0x2b2   :  { %700 = vrot.lane.b32.xlu0 %v1302_v6, %s1232_s19 }
 0x2b4   :  { %798 = vrot.lane.b32.xlu1 %v1307_v7, %s1233_s20 }
 0x2b6   :  { %796 = vrot.lane.b32.xlu0 %v1302_v6, %s1233_s20 }
 0x2b8   :  { %748 = vrot.lane.b32.xlu1 %v1302_v6, %s1231_s5 }
 0x2ba   :  { %746 = vrot.lane.b32.xlu0 %v1297_v5, %s1231_s5 }
 0x2bc   :  { %698 = vrot.lane.b32.xlu1 %v1297_v5, %s1232_s19 }
 0x2be   :  { %696 = vrot.lane.b32.xlu0 %v1290_v3, %s1232_s19 }
 0x2c0   :  { %794 = vrot.lane.b32.xlu1 %v1297_v5, %s1233_s20 }
 0x2c2   :  { %792 = vrot.lane.b32.xlu0 %v1290_v3, %s1233_s20 }
 0x2c4   :  { %v463_v7 = vpop.xlane.xlu0 %462  ;;  %744 = vrot.lane.b32.xlu1 %v1290_v3, %s1231_s5 }
 0x2c5   :  { %1192 = vrcp.f32 %v463_v7 }
 0x2c6   :  { %742 = vrot.lane.b32.xlu0 %v1285_v2, %s1231_s5 }
 0x2c8   :  { %v466_v6 = vpop.xlane.xlu1 %465  ;;  %v469_v8 = vpop.xlane.xlu0 %468  ;;  %694 = vrot.lane.b32.xlu1 %v1285_v2, %s1232_s19 }
 0x2c9   :  { %1194 = vrcp.f32 %v466_v6 }
 0x2ca   :  { %1196 = vrcp.f32 %v469_v8 }
 0x2cc   :  { %v472_v11 = vpop.xlane.xlu1 %471  ;;  %v475_v5 = vpop.xlane.xlu0 %474  ;;  %790 = vrot.lane.b32.xlu1 %v1285_v2, %s1233_s20 }
 0x2cd   :  { %1198 = vrcp.f32 %v472_v11 }
 0x2ce   :  { %1200 = vrcp.f32 %v475_v5 }
 0x2d0   :  { %v478_v63 = vpop.xlane.xlu1 %477 }
 0x2d1   :  { %1202 = vrcp.f32 %v478_v63  ;;  %v481_v3 = vpop.xlane.xlu0 %480 }
 0x2d2   :  { %1204 = vrcp.f32 %v481_v3  ;;  %v1193_v33 = vpop.eup %1192 }
 0x2d3   :  { %v525_v38 = vmul.f32 %v1193_v33, %v1482_v22 }
 0x2d4   :  { %v484_v36 = vpop.xlane.xlu1 %483 }
 0x2d5   :  { %1206 = vrcp.f32 %v484_v36  ;;  %v487_v37 = vpop.xlane.xlu0 %486 }
 0x2d6   :  { %v1195_v41 = vpop.eup %1194  ;;  %1208 = vrcp.f32 %v487_v37 }
 0x2d7   :  { %v526_v1 = vmul.f32 %v1195_v41, %v1490_v32  ;;  %v1197_v15 = vpop.eup %1196 }
 0x2d8   :  { %v490_v43 = vpop.xlane.xlu1 %489  ;;  %v527_v48 = vmul.f32 %v1197_v15, %v1486_v57 }
 0x2d9   :  { %1210 = vrcp.f32 %v490_v43  ;;  %v493_v2 = vpop.xlane.xlu0 %492  ;;  %v541_v45 = vpack.c.bf16 %v526_v1, %v525_v38 }
 0x2da   :  { %v1199_v46 = vpop.eup %1198  ;;  %1212 = vrcp.f32 %v493_v2 }
 0x2db   :  { %v528_v49 = vmul.f32 %v1199_v46, %v1496_v39  ;;  %1099 = vmatprep.mubr.msk.bf16.mxu0 %vm364_vm1, %v541_v45  ;;  %v1201_v50 = vpop.eup %1200 }
 0x2dc   :  { %v496_v21 = vpop.xlane.xlu1 %495  ;;  %v529_v32 = vmul.f32 %v1201_v50, %v1500_v42 }
 0x2dd   :  { %v542_v27 = vpack.c.bf16 %v528_v49, %v527_v48  ;;  %1214 = vrcp.f32 %v496_v21  ;;  %v499_v22 = vpop.xlane.xlu0 %498 }
 0x2de   :  { %v1203_v55 = vpop.eup %1202  ;;  %1216 = vrcp.f32 %v499_v22 }
 0x2df   :  { %1100 = vmatmul.mubr.msk.bf16.vlgmr.msra.gmra.mxu0 %vm364_vm1, %v542_v27  ;;  %v530_v56 = vmul.f32 %v1203_v55, %v1508_v51  ;;  %v1205_v58 = vpop.eup %1204 }
 0x2e0   :  { %v502_v57 = vpop.xlane.xlu1 %501  ;;  %v531_v34 = vmul.f32 %v1205_v58, %v1510_v53 }
 0x2e1   :  { %1218 = vrcp.f32 %v502_v57  ;;  %v505_v39 = vpop.xlane.xlu0 %504  ;;  %v543_v60 = vpack.c.bf16 %v530_v56, %v529_v32 }
 0x2e2   :  { %v1207_v40 = vpop.eup %1206  ;;  %1220 = vrcp.f32 %v505_v39 }
 0x2e3   :  { %1103 = vmatprep.mubr.msk.bf16.mxu0 %vm364_vm1, %v543_v60  ;;  %v532_v30 = vmul.f32 %v1207_v40, %v1517_v29  ;;  %v1209_v62 = vpop.eup %1208 }
 0x2e4   :  { %v508_v44 = vpop.xlane.xlu1 %507  ;;  %v533_v51 = vmul.f32 %v1209_v62, %v1519_v61 }
 0x2e5   :  { %1222 = vrcp.f32 %v508_v44  ;;  %v544_v35 = vpack.c.bf16 %v532_v30, %v531_v34 }
 0x2e6   :  { %v1211_v42 = vpop.eup %1210 }
 0x2e7   :  { %1104 = vmatmul.mubr.msk.bf16.gmra.mxu0 %vm364_vm1, %v544_v35  ;;  %v534_v9 = vmul.f32 %v1211_v42, %v1525_v0  ;;  %v1213_v16 = vpop.eup %1212 }
 0x2e8   :  { %v535_v53 = vmul.f32 %v1213_v16, %v1527_v4  ;;  %v773_v3 = vpop.permute.xlu1 %772 }
 0x2e9   :  { %v545_v52 = vpack.c.bf16 %v534_v9, %v533_v51 }
 0x2ea   :  { %v1215_v54 = vpop.eup %1214 }
 0x2eb   :  { %1107 = vmatprep.mubr.msk.bf16.mxu0 %vm364_vm1, %v545_v52  ;;  %v536_v29 = vmul.f32 %v1215_v54, %v1533_v47  ;;  %v1217_v28 = vpop.eup %1216  ;;  %v1234_v47 = vmov 0.0  }
 0x2ec   :  { %v537_v6 = vmul.f32 %v1217_v28, %v1535_v10  ;;  %1115 = vmatprep.subr.mxu1 %v1234_v47  ;;  %v821_v33 = vpop.permute.xlu1 %820  ;;  %v725_v10 = vpop.permute.xlu0 %724  ;;  %1147 = vmatprep.mubr.msk.f32.mxu1 %vm1235_vm2, %v1234_v47 }
 0x2ed   :  { %v546_v59 = vpack.c.bf16 %v536_v29, %v535_v53  ;;  %v853_v16 = vsel %vm74_vm0, %v1381_v24, %v725_v10 }
 0x2ee   :  { %v1219_v7 = vpop.eup %1218  ;;  %v870_v29 = vsel %vm854_vm3, %v853_v16, %v773_v3 }
 0x2ef   :  { %1108 = vmatmul.mubr.msk.bf16.gmra.mxu0 %vm364_vm1, %v546_v59  ;;  %v538_v61 = vmul.f32 %v1219_v7, %v1541_v25  ;;  %v1221_v8 = vpop.eup %1220 }
 0x2f0   :  { %v539_v5 = vmul.f32 %v1221_v8, %v1543_v26  ;;  %v723_v36 = vpop.permute.xlu1 %722  ;;  %v771_v25 = vpop.permute.xlu0 %770 }
 0x2f1   :  { %v547_v0 = vpack.c.bf16 %v538_v61, %v537_v6  ;;  %v852_v28 = vsel %vm74_vm0, %v1376_v23, %v723_v36  ;;  %v887_v61 = vsel %vm871_vm4, %v870_v29, %v821_v33 }
 0x2f2   :  { %v1223_v11 = vpop.eup %1222  ;;  %v869_v8 = vsel %vm854_vm3, %v852_v28, %v771_v25 }
 0x2f3   :  { %1111 = vmatprep.mubr.msk.bf16.mxu0 %vm364_vm1, %v547_v0  ;;  %v540_v4 = vmul.f32 %v1223_v11, %v1549_v31 }
 0x2f4   :  { %v819_v37 = vpop.permute.xlu1 %818  ;;  %v721_v41 = vpop.permute.xlu0 %720 }
 0x2f5   :  { %v548_v63 = vpack.c.bf16 %v540_v4, %v539_v5  ;;  %v851_v11 = vsel %vm74_vm0, %v1365_v20, %v721_v41  ;;  %v886_v4 = vsel %vm871_vm4, %v869_v8, %v819_v37 }
 0x2f7   :  { %1112 = vmatmul.mubr.msk.bf16.gmra.mxu0 %vm364_vm1, %v548_v63 }
 0x2f8   :  { %v769_v38 = vpop.permute.xlu1 %768  ;;  %v817_v26 = vpop.permute.xlu0 %816 }
 0x2f9   :  { %v868_v23 = vsel %vm854_vm3, %v851_v11, %v769_v38 }
 0x2fa   :  { %v885_v20 = vsel %vm871_vm4, %v868_v23, %v817_v26 }
 0x2fc   :  { %v719_v1 = vpop.permute.xlu1 %718  ;;  %v767_v31 = vpop.permute.xlu0 %766 }
 0x2fd   :  { %v850_v3 = vsel %vm74_vm0, %v1360_v19, %v719_v1 }
 0x2fe   :  { %v867_v25 = vsel %vm854_vm3, %v850_v3, %v767_v31  ;;  %v1228_v3 = vld [vmem:[%s1850_s0 + $0x10] sm:$0xff] }
 0x300   :  { %v1675_v15 = vpop.permute.xlu1 %814  ;;  %v717_v43 = vpop.permute.xlu0 %716 }
 0x301   :  { %v849_v36 = vsel %vm74_vm0, %v1355_v18, %v717_v43  ;;  %v884_v1 = vsel %vm871_vm4, %v867_v25, %v1675_v15  ;;  %v1229_v25 = vld [vmem:[%s1850_s0 + $0x8] sm:$0xff] }
 0x304   :  { %v765_v2 = vpop.permute.xlu1 %764  ;;  %v1677_v45 = vpop.permute.xlu0 %812 }
 0x305   :  { %v866_v38 = vsel %vm854_vm3, %v849_v36, %v765_v2 }
 0x306   :  { %v883_v26 = vsel %vm871_vm4, %v866_v38, %v1677_v45 }
 0x308   :  { %v715_v46 = vpop.permute.xlu1 %714  ;;  %v1679_v48 = vpop.permute.xlu0 %762 }
 0x309   :  { %v848_v19 = vsel %vm74_vm0, %v1350_v17, %v715_v46 }
 0x30a   :  { %v865_v31 = vsel %vm854_vm3, %v848_v19, %v1679_v48 }
 0x30c   :  { %v1681_v49 = vpop.permute.xlu1 %810  ;;  %v1683_v50 = vpop.permute.xlu0 %712 }
 0x30d   :  { %v847_v2 = vsel %vm74_vm0, %v1339_v14, %v1683_v50  ;;  %v882_v15 = vsel %vm871_vm4, %v865_v31, %v1681_v49 }
 0x310   :  { %v1685_v21 = vpop.permute.xlu1 %760  ;;  %v1689_v22 = vpop.permute.xlu0 %808 }
 0x311   :  { %v864_v46 = vsel %vm854_vm3, %v847_v2, %v1685_v21 }
 0x312   :  { %v881_v50 = vsel %vm871_vm4, %v864_v46, %v1689_v22  ;;  %v1224_v22 = vld [vmem:[%s1850_s0 + $0x30] sm:$0xff] }
 0x314   :  { %v1695_v56 = vpop.permute.xlu1 %710  ;;  %v1699_v57 = vpop.permute.xlu0 %758 }
 0x315   :  { %v846_v45 = vsel %vm74_vm0, %v1334_v13, %v1695_v56 }
 0x318   :  { %v1705_v40 = vpop.permute.xlu1 %806  ;;  %v1709_v30 = vpop.permute.xlu0 %708 }
 0x319   :  { %v845_v49 = vsel %vm74_vm0, %v1329_v12, %v1709_v30 }
 0x31c   :  { %v1713_v35 = vpop.permute.xlu1 %756  ;;  %v1717_v51 = vpop.permute.xlu0 %804 }
 0x31d   :  { %v862_v56 = vsel %vm854_vm3, %v845_v49, %v1713_v35 }
 0x31e   :  { %v879_v30 = vsel %vm871_vm4, %v862_v56, %v1717_v51 }
 0x320   :  { %v1721_v54 = vpop.permute.xlu1 %706  ;;  %v1726_v59 = vpop.permute.xlu0 %754 }
 0x324   :  { %v1730_v24 = vpop.permute.xlu1 %802  ;;  %v705_v5 = vpop.permute.xlu0 %704 }
 0x328   :  { %v753_v10 = vpop.permute.xlu1 %752  ;;  %v801_v41 = vpop.permute.xlu0 %800 }
 0x32c   :  { %v703_v18 = vpop.permute.xlu1 %702  ;;  %v751_v16 = vpop.permute.xlu0 %750 }
 0x330   :  { %v701_v14 = vpop.permute.xlu0 %700 }
 0x39f   :  { %v1687_v27 = vpop.f32.mrf.mxu0 }
 0x3a1   :  { %v1691_v55 = vpop.f32.mrf.mxu0 }
 0x3a3   :  { %v1693_v32 = vpop.f32.mrf.mxu0 }
 0x3a5   :  { %v1697_v58 = vpop.f32.mrf.mxu0 }
 0x3a7   :  { %v1701_v39 = vpop.f32.mrf.mxu0 }
 0x3a9   :  { %v1703_v60 = vpop.f32.mrf.mxu0 }
 0x3ab   :  { %v1707_v34 = vpop.f32.mrf.mxu0 }
 0x3ad   :  { %v1711_v62 = vpop.f32.mrf.mxu0 }
 0x3af   :  { %v1109_v44 = vpop.f32.mrf.mxu0 }
 0x3b0   :  { %v898_v48 = vmul.f32 %v1109_v44, %v882_v15  ;;  %v797_v44 = vpop.permute.xlu0 %796 }
 0x3b1   :  { %v1715_v42 = vpop.f32.mrf.mxu0 }
 0x3b3   :  { %v1110_v9 = vpop.f32.mrf.mxu0 }
 0x3b4   :  { %v899_v17 = vmul.f32 %v1110_v9, %v883_v26  ;;  %v863_v9 = vsel %vm854_vm3, %v846_v45, %v1699_v57  ;;  %v844_v57 = vsel %vm74_vm0, %v1224_v22, %v1721_v54  ;;  %v895_v54 = vmul.f32 %v1707_v34, %v879_v30 }
 0x3b5   :  { %v650_v52 = vpop.f32.mrf.mxu0  ;;  %v880_v13 = vsel %vm871_vm4, %v863_v9, %v1705_v40  ;;  %v861_v40 = vsel %vm854_vm3, %v844_v57, %v1726_v59  ;;  %v1226_v59 = vld [vmem:[%s1850_s0 + $0x20] sm:$0xff] }
 0x3b6   :  { %v897_v29 = vmul.f32 %v881_v50, %v650_v52  ;;  %v896_v12 = vmul.f32 %v880_v13, %v1715_v42  ;;  %v1225_v52 = vld [vmem:[%s1850_s0 + $0x28] sm:$0xff]  ;;  %v878_v42 = vsel %vm871_vm4, %v861_v40, %v1730_v24  ;;  %v1227_v24 = vld [vmem:[%s1850_s0 + $0x18] sm:$0xff] }
 0x3b7   :  { %v1113_v53 = vpop.f32.mrf.mxu0  ;;  %v843_v28 = vsel %vm74_vm0, %v1225_v52, %v705_v5  ;;  %v894_v8 = vmul.f32 %v1701_v39, %v878_v42  ;;  %v841_v11 = vsel %vm74_vm0, %v1227_v24, %v701_v14 }
 0x3b8   :  { %v902_v63 = vmul.f32 %v1113_v53, %v886_v4  ;;  %v799_v53 = vpop.permute.xlu1 %798  ;;  %v860_v51 = vsel %vm854_vm3, %v843_v28, %v753_v10 }
 0x3b9   :  { %v663_v7 = vpop.f32.mrf.mxu0  ;;  %v877_v34 = vsel %vm871_vm4, %v860_v51, %v801_v41 }
 0x3ba   :  { %v900_v43 = vmul.f32 %v884_v1, %v663_v7  ;;  %v747_v7 = vpop.permute.xlu0 %746  ;;  %v893_v4 = vmul.f32 %v877_v34, %v1711_v62  ;;  %v1230_v1 = vld [vmem:[%s1850_s0] sm:$0xff] }
 0x3bb   :  { %v1114_v6 = vpop.f32.mrf.mxu0 }
 0x3bc   :  { %v903_v0 = vmul.f32 %v1114_v6, %v887_v61  ;;  %v749_v21 = vpop.permute.xlu1 %748  ;;  %v842_v6 = vsel %vm74_vm0, %v1226_v59, %v703_v18 }
 0x3bd   :  { %v666_v33 = vpop.f32.mrf.mxu0  ;;  %v858_v39 = vsel %vm854_vm3, %v841_v11, %v749_v21 }
 0x3be   :  { %1116 = vmatpush3.xpose.msra.mxu1 %v903_v0  ;;  %v901_v37 = vmul.f32 %v885_v20, %v666_v33  ;;  %v859_v0 = vsel %vm854_vm3, %v842_v6, %v751_v16  ;;  %v697_v5 = vpop.permute.xlu0 %696  ;;  %v875_v20 = vsel %vm871_vm4, %v858_v39, %v797_v44 }
 0x3bf   :  { %1117 = vmatprep.subr.mxu1 %v1234_v47  ;;  %v876_v23 = vsel %vm871_vm4, %v859_v0, %v799_v53  ;;  %v891_v38 = vmul.f32 %v1693_v32, %v875_v20 }
 0x3c0   :  { %v699_v35 = vpop.permute.xlu1 %698  ;;  %v892_v10 = vmul.f32 %v876_v23, %v1703_v60 }
 0x3c1   :  { %v840_v33 = vsel %vm74_vm0, %v1228_v3, %v699_v35 }
 0x3c2   :  { %1118 = vmatpush3.xpose.msra.mxu1 %v902_v63  ;;  %v793_v36 = vpop.permute.xlu0 %792  ;;  %v857_v62 = vsel %vm854_vm3, %v840_v33, %v747_v7 }
 0x3c3   :  { %1119 = vmatprep.subr.mxu1 %v1234_v47 }
 0x3c4   :  { %v795_v61 = vpop.permute.xlu1 %794 }
 0x3c5   :  { %v874_v19 = vsel %vm871_vm4, %v857_v62, %v795_v61 }
 0x3c6   :  { %1120 = vmatpush3.xpose.msra.mxu1 %v901_v37  ;;  %v839_v37 = vsel %vm74_vm0, %v1229_v25, %v697_v5  ;;  %v890_v26 = vmul.f32 %v1687_v27, %v874_v19  ;;  %v904_v27 = vld [vmem:[%s1855_s6] sm:$0xf] }
 0x3c7   :  { %1121 = vmatprep.subr.mxu1 %v1234_v47 }
 0x3c8   :  { %v745_v63 = vpop.permute.xlu1 %744 }
 0x3c9   :  { %v856_v60 = vsel %vm854_vm3, %v839_v37, %v745_v63 }
 0x3ca   :  { %1122 = vmatpush3.xpose.msra.mxu1 %v900_v43  ;;  %v743_v43 = vpop.permute.xlu0 %742  ;;  %v873_v31 = vsel %vm871_vm4, %v856_v60, %v793_v36 }
 0x3cb   :  { %1123 = vmatprep.subr.mxu1 %v1234_v47  ;;  %v889_v16 = vmul.f32 %v873_v31, %v1697_v58 }
 0x3cc   :  { %v695_v41 = vpop.permute.xlu1 %694 }
 0x3cd   :  { %v838_v18 = vsel %vm74_vm0, %v1230_v1, %v695_v41 }
 0x3ce   :  { %1124 = vmatpush3.xpose.msra.mxu1 %v899_v17  ;;  %v855_v32 = vsel %vm854_vm3, %v838_v18, %v743_v43 }
 0x3cf   :  { %1125 = vmatprep.subr.mxu1 %v1234_v47 }
 0x3d0   :  { %v791_v2 = vpop.permute.xlu1 %790 }
 0x3d1   :  { %v872_v17 = vsel %vm871_vm4, %v855_v32, %v791_v2 }
 0x3d2   :  { %1126 = vmatpush3.xpose.msra.mxu1 %v898_v48  ;;  %v888_v15 = vmul.f32 %v872_v17, %v1691_v55 }
 0x3d3   :  { %1127 = vmatprep.subr.mxu1 %v1234_v47 }
 0x3d6   :  { %1128 = vmatpush3.xpose.msra.mxu1 %v897_v29 }
 0x3d7   :  { %1129 = vmatprep.subr.mxu1 %v1234_v47 }
 0x3da   :  { %1130 = vmatpush3.xpose.msra.mxu1 %v896_v12 }
 0x3db   :  { %1131 = vmatprep.subr.mxu1 %v1234_v47 }
 0x3de   :  { %1132 = vmatpush3.xpose.msra.mxu1 %v895_v54 }
 0x3df   :  { %1133 = vmatprep.subr.mxu1 %v1234_v47 }
 0x3e2   :  { %1134 = vmatpush3.xpose.msra.mxu1 %v894_v8 }
 0x3e3   :  { %1135 = vmatprep.subr.mxu1 %v1234_v47 }
 0x3e6   :  { %1136 = vmatpush3.xpose.msra.mxu1 %v893_v4 }
 0x3e7   :  { %1137 = vmatprep.subr.mxu1 %v1234_v47 }
 0x3ea   :  { %1138 = vmatpush3.xpose.msra.mxu1 %v892_v10 }
 0x3eb   :  { %1139 = vmatprep.subr.mxu1 %v1234_v47 }
 0x3ee   :  { %1140 = vmatpush3.xpose.msra.mxu1 %v891_v38 }
 0x3ef   :  { %1141 = vmatprep.subr.mxu1 %v1234_v47 }
 0x3f2   :  { %1142 = vmatpush3.xpose.msra.mxu1 %v890_v26 }
 0x3f3   :  { %1143 = vmatprep.subr.mxu1 %v1234_v47 }
 0x3f6   :  { %1144 = vmatpush3.xpose.msra.mxu1 %v889_v16 }
 0x3f7   :  { %1145 = vmatprep.subr.mxu1 %v1234_v47 }
 0x3fa   :  { %1146 = vmatpush3.xpose.msra.mxu1 %v888_v15 }
 0x3fd   :  { %1148 = vmatmul.mubr.f32.vlgmr.msra.gmra.mxu1 %v904_v27 }
 0x4bd   :  { %v971_v46 = vpop.f32.mrf.mxu1 }
 0x4be   :  { %975 = vst [vmem:[%s1856_s7] sm:$0xf] %v971_v46 }
 0x4bf   :  { %v1149_v53 = vpop.f32.mrf.mxu1 }

</bundles_post_ra>
